<compile_context>
chip_gen: v5e
topology: v5e:2x2
jax: 0.10.0
libtpu: 0.0.40
codegen_flags: <defaults>
</compile_context>

<pallas_src>
import jax
import jax.numpy as jnp
from jax.experimental import pallas as pl
from jax.experimental.pallas import tpu as pltpu

_LANE = 128
_SUBLANE = 8
_VMEM_BUDGET = 40 * 1024 * 1024   # conservative: fits v7x 64 MiB/TC with headroom
_VMEM_LIMIT = 48 * 1024 * 1024


def _round_up(x, m):
    return ((x + m - 1) // m) * m


def prepare_weight(weight, dtype=jnp.bfloat16):
    """One-time parameter prep (runs outside the per-call path).

    nn.Linear stores W as (L, C*L); the kernel consumes the transposed,
    zero-padded (Kp, Np) slab (Kp = round_up(C*L, 128), Np = round_up(L, 128)),
    stored in bf16 by default to halve the dominant HBM weight stream.
    """
    w = jnp.asarray(weight)
    L, K = w.shape
    Kp = _round_up(K, _LANE)
    Np = _round_up(L, _LANE)
    w_t = w.T.astype(dtype)                               # (K, L)
    if (Kp, Np) != (K, L):
        w_t = jnp.zeros((Kp, Np), dtype).at[:K, :L].set(w_t)
    return w_t


# ---------------------------------------------------------------- kernels ----

def _fused_kernel(x_ref, w_ref, o_ref):
    # Full-K blocks: one MXU pass per output tile, tanh fused in the epilogue.
    o_ref[...] = jnp.tanh(
        jnp.dot(x_ref[...], w_ref[...], preferred_element_type=jnp.float32)
    ).astype(o_ref.dtype)


def _ktiled_kernel(x_ref, w_ref, o_ref):
    # Fallback (K too large for a single block): accumulate directly into the
    # f32 output block (resident across the K axis) - no scratch accumulator.
    k = pl.program_id(2)
    part = jnp.dot(x_ref[...], w_ref[...], preferred_element_type=jnp.float32)

    @pl.when(k == 0)
    def _():
        o_ref[...] = part

    @pl.when(k > 0)
    def _():
        o_ref[...] += part

    @pl.when(k == pl.num_programs(2) - 1)
    def _():
        o_ref[...] = jnp.tanh(o_ref[...])


# ----------------------------------------------------------- tile selection ----

def _pick_fast_tiles(Mp, Np, Kp, isz):
    """Largest (tm, tn) whose full-K double-buffered blocks fit the VMEM budget."""
    for tn in (512, 256, 128):
        if Np % tn:
            continue
        for tm in (512, 256, 128, 64, 32, 16, 8):
            if Mp % tm:
                continue
            if 2 * tm * Kp * isz + 2 * Kp * tn * isz + 2 * tm * tn * 4 <= _VMEM_BUDGET:
                return tm, tn
    return None


def _pick_ktiled_tiles(Mp, Np, Kp, isz):
    for tk in (2048, 1024, 512, 256, 128):
        if Kp % tk:
            continue
        for tn in (512, 256, 128):
            if Np % tn:
                continue
            for tm in (512, 256, 128, 64, 32, 16, 8):
                if Mp % tm:
                    continue
                if 2 * tm * tk * isz + 2 * tk * tn * isz + 2 * tm * tn * 4 <= _VMEM_BUDGET:
                    return tm, tn, tk
    raise ValueError(f"no feasible tiling for Kp={Kp}")


# ----------------------------------------------------------------- wrapper ----

@jax.jit
def wiener_cascade_decoder_linear(x, weight_p):
    """x: (B, C, L) f32; weight_p: padded (Kp, Np) slab from prepare_weight()."""
    B, C, L = x.shape
    K = C * L
    Kp, Np = weight_p.shape
    assert Kp == _round_up(K, _LANE) and Np == _round_up(L, _LANE), \
        "weight_p must come from prepare_weight() for this x shape"

    Mp = _round_up(B, _SUBLANE)
    in_dtype = weight_p.dtype
    isz = jnp.dtype(in_dtype).itemsize

    # x is batch-sized (tiny next to the weight): pad + cast per call is cheap.
    x_flat = x.reshape(B, K)
    x_p = jnp.zeros((Mp, Kp), in_dtype).at[:B, :K].set(x_flat.astype(in_dtype))

    fast = _pick_fast_tiles(Mp, Np, Kp, isz)
    if fast is not None:
        tm, tn = fast
        # v7x has 2 TensorCores: try to expose >=2 parallel grid blocks.
        if (Mp // tm) * (Np // tn) == 1:
            if tn >= 256:
                tn //= 2
            elif tm >= 16:
                tm //= 2
        ni, nj = Mp // tm, Np // tn
        # N-tiles outer, M-tiles inner -> weight block (0, j) is constant across
        # the inner axis, so the weight is DMA'd from HBM exactly once.
        grid = (nj, ni)
        cost = pl.CostEstimate(
            flops=2 * Mp * Kp * Np,
            transcendentals=Mp * Np,
            bytes_accessed=nj * Mp * Kp * isz + Kp * Np * isz + Mp * Np * 4,
        )
        out_p = pl.pallas_call(
            _fused_kernel,
            out_shape=jax.ShapeDtypeStruct((Mp, Np), jnp.float32),
            grid_spec=pltpu.PrefetchScalarGridSpec(
                num_scalar_prefetch=0,
                grid=grid,
                in_specs=[
                    pl.BlockSpec((tm, Kp), lambda j, i: (i, 0)),
                    pl.BlockSpec((Kp, tn), lambda j, i: (0, j)),
                ],
                out_specs=pl.BlockSpec((tm, tn), lambda j, i: (i, j)),
            ),
            compiler_params=pltpu.CompilerParams(
                dimension_semantics=("parallel", "parallel"),
                vmem_limit_bytes=_VMEM_LIMIT),
            cost_estimate=cost,
        )(x_p, weight_p)
    else:
        tm, tn, tk = _pick_ktiled_tiles(Mp, Np, Kp, isz)
        ni, nj, nk = Mp // tm, Np // tn, Kp // tk
        grid = (ni, nj, nk)                      # reduction axis last
        cost = pl.CostEstimate(
            flops=2 * Mp * Kp * Np,
            transcendentals=Mp * Np,
            bytes_accessed=nj * Mp * Kp * isz + ni * Kp * Np * isz + Mp * Np * 4,
        )
        out_p = pl.pallas_call(
            _ktiled_kernel,
            out_shape=jax.ShapeDtypeStruct((Mp, Np), jnp.float32),
            grid_spec=pltpu.PrefetchScalarGridSpec(
                num_scalar_prefetch=0,
                grid=grid,
                in_specs=[
                    pl.BlockSpec((tm, tk), lambda i, j, k: (i, k)),
                    pl.BlockSpec((tk, tn), lambda i, j, k: (k, j)),
                ],
                out_specs=pl.BlockSpec((tm, tn), lambda i, j, k: (i, j)),
            ),
            compiler_params=pltpu.CompilerParams(
                dimension_semantics=("parallel", "parallel", "arbitrary"),
                vmem_limit_bytes=_VMEM_LIMIT),
            cost_estimate=cost,
        )(x_p, weight_p)

    # Slice away padding (tanh(0) never leaks); reshape to (B, 1, L).
    return out_p[:B, :L].astype(x.dtype).reshape(B, 1, L)


def _reference(x, weight):
    B, C, L = x.shape
    x_flat = x.reshape(B, C * L)
    return jnp.tanh(x_flat @ jnp.asarray(weight).T).reshape(B, 1, L)


if __name__ == "__main__":
    # Small shapes consistent with the module: batch=2, n_components=4, input_length=16
    B, C, L = 2, 4, 16
    K = C * L

    key = jax.random.PRNGKey(0)
    kx, kw = jax.random.split(key)

    x = jax.random.normal(kx, (B, C, L), dtype=jnp.float32)
    # nn.Linear-style init: U(-1/sqrt(fan_in), 1/sqrt(fan_in)), no bias.
    bound = 1.0 / (K ** 0.5)
    weight = jax.random.uniform(kw, (L, K), dtype=jnp.float32,
                                minval=-bound, maxval=bound)

    weight_p = prepare_weight(weight)            # one-time: transpose+pad+bf16

    out = wiener_cascade_decoder_linear(x, weight_p)
    out = jax.block_until_ready(out)

    ref = _reference(x, weight)                  # f32 reference
    assert out.shape == (B, 1, L)
    # bf16 input streams with f32 MXU accumulation -> ~1e-2 tolerance on tanh output.
    assert jnp.allclose(out, ref, atol=2e-2, rtol=2e-2), "mismatch vs reference"

    print("KERNEL_OK")
</pallas_src>

<mosaic_0001>
module attributes {stable_mosaic.version = 11 : i64} {
  func.func @_fused_kernel(%arg0: i32, %arg1: i32, %arg2: memref<8x128xbf16, #tpu.memory_space<vmem>>, %arg3: memref<128x128xbf16, #tpu.memory_space<vmem>>, %arg4: memref<8x128xf32, #tpu.memory_space<vmem>>) attributes {dimension_semantics = [#tpu.dimension_semantics<parallel>, #tpu.dimension_semantics<parallel>], iteration_bounds = array<i64: 1, 1>, scalar_prefetch = 0 : i64, scratch_operands = 0 : i64, tpu.core_type = #tpu.core_type<tc>, window_params = [{transform_indices = @transform_0, window_bounds = array<i64: 8, 128>}, {transform_indices = @transform_1, window_bounds = array<i64: 128, 128>}, {transform_indices = @transform_2, window_bounds = array<i64: 8, 128>}]} {
    %c0 = arith.constant 0 : index
    %c0_0 = arith.constant 0 : index
    %0 = vector.load %arg2[%c0, %c0_0] : memref<8x128xbf16, #tpu.memory_space<vmem>>, vector<8x128xbf16>
    %c0_1 = arith.constant 0 : index
    %c0_2 = arith.constant 0 : index
    %1 = vector.load %arg3[%c0_1, %c0_2] : memref<128x128xbf16, #tpu.memory_space<vmem>>, vector<128x128xbf16>
    %cst = arith.constant dense<0.000000e+00> : vector<8x128xf32>
    %2 = tpu.matmul %0, %1, %cst {dimension_numbers = #tpu.dot_dimension_numbers<[1], [0], [0], [1], [0, 0, 1, 1], [], []>} : vector<8x128xbf16>, vector<128x128xbf16>, vector<8x128xf32> -> vector<8x128xf32>
    %3 = math.tanh %2 : vector<8x128xf32>
    %c0_3 = arith.constant 0 : index
    %c0_4 = arith.constant 0 : index
    %4 = vector.load %arg4[%c0_3, %c0_4] : memref<8x128xf32, #tpu.memory_space<vmem>>, vector<8x128xf32>
    tpu.vector_store %arg4[%c0_3, %c0_4], %3 {strides = array<i32>} : memref<8x128xf32, #tpu.memory_space<vmem>>, vector<8x128xf32>,
    return
  }
  func.func @transform_0(%arg0: i32, %arg1: i32) -> (i32, i32) {
    %c0_i32 = arith.constant 0 : i32
    %c0_i32_0 = arith.constant 0 : i32
    return %arg1, %c0_i32 : i32, i32
  }
  func.func @transform_1(%arg0: i32, %arg1: i32) -> (i32, i32) {
    %c0_i32 = arith.constant 0 : i32
    %c0_i32_0 = arith.constant 0 : i32
    return %c0_i32, %arg0 : i32, i32
  }
  func.func @transform_2(%arg0: i32, %arg1: i32) -> (i32, i32) {
    %c0_i32 = arith.constant 0 : i32
    return %arg1, %arg0 : i32, i32
  }
}

</mosaic_0001>

<bundles_post_ra>
// kernel: wiener_cascade_decoder_linear.1
= control target key start
LH: loop header
LB: loop body
LE: loop exit
PB: predicated region body
PF: predicated region fallthrough
CT: control target
= control target key end

     0   :  { %7 = vsyncpa [#allocation3], 0  ;;  %s183_s12 = smov [#allocation2]   ;;  %s184_s14 = smov 64   ;;  %s210_s0 = inlined_call_operand.vmem [shape: bf16[8,128], index: 0, kind: input, shape index: {}]   ;;  %s211_s1 = inlined_call_operand.hbm [shape: bf16[128,128], index: 1, kind: input, shape index: {}]   ;;  %s212_s2 = inlined_call_operand.vmem [shape: f32[8,128], index: 2, kind: output, shape index: {}]  }
   0x1   :  { %s14_s11 = sshll.u32 %s211_s1, 4  ;;  %s16_s13 = sshll.u32 %s183_s12, 4  ;;  %s15_s11 = int_to_ptr.hbm [resolvable:$true] %s14_s11  ;;  %s17_s13 = int_to_ptr.vmem [resolvable:$true] %s16_s13 }
   0x2   :  { %s185_s15 = smov 4  }
   0x3   :  { %22 = dma.hbm_to_vmem [thread:$0]  %s15_s11, 1024, %s17_s13, [#allocation3], %s184_s14, %s184_s14, %s185_s15  }
   0x4   :  { %181 = dma.done.wait [#allocation3], 1024  }
   0x5   :  { %182 = vsyncadd [#allocation3], 4294966272  ;;  %v151_v0 = vld [vmem:[#allocation2 + $0x38] sm:$0xff]  ;;  %v150_v1 = vld [vmem:[#allocation2 + $0x30] sm:$0xff] }
   0x6   :  { %92 = vmatpush.bf16.msra.mxu0 %v151_v0  ;;  %v149_v2 = vld [vmem:[#allocation2 + $0x28] sm:$0xff]  ;;  %v148_v3 = vld [vmem:[#allocation2 + $0x20] sm:$0xff]  ;;  %v147_v4 = vld [vmem:[#allocation2 + $0x18] sm:$0xff] }
   0x7   :  { %v146_v5 = vld [vmem:[#allocation2 + $0x10] sm:$0xff]  ;;  %v145_v6 = vld [vmem:[#allocation2 + $0x8] sm:$0xff]  ;;  %v144_v7 = vld [vmem:[#allocation2] sm:$0xff] }
   0x8   :  { %v27_v8 = vld [vmem:[%s210_s0] sm:$0xf] }
   0xa   :  { %93 = vmatpush.bf16.msra.mxu0 %v150_v1 }
   0xe   :  { %94 = vmatpush.bf16.msra.mxu0 %v149_v2 }
  0x12   :  { %95 = vmatpush.bf16.msra.mxu0 %v148_v3 }
  0x16   :  { %96 = vmatpush.bf16.msra.mxu0 %v147_v4 }
  0x1a   :  { %97 = vmatpush.bf16.msra.mxu0 %v146_v5 }
  0x1e   :  { %98 = vmatpush.bf16.msra.mxu0 %v145_v6 }
  0x22   :  { %99 = vmatpush.bf16.msra.mxu0 %v144_v7 }
  0x25   :  { %100 = vmatmul.bf16.vlgmr.msra.gmra.mxu0 %v27_v8 }
  0xa2   :  { %v101_v9 = vpop.f32.mrf.mxu0 }
  0xa3   :  { %155 = vtanh.f32 %v101_v9 }
  0xa9   :  { %v156_v10 = vpop.eup %155 }
  0xaa   :  { %106 = vst [vmem:[%s212_s2] sm:$0xff] %v156_v10  ;;  %v103_v11 = vpop.f32.mrf.mxu0 }
  0xab   :  { %111 = vsyncpa [#allocation3], 1 }

</bundles_post_ra>
